<compile_context>
chip_gen: v7x
topology: tpu7x:2x2x1
jax: 0.10.0
libtpu: 0.0.40
codegen_flags: <defaults>
</compile_context>

<pallas_src>
from dataclasses import dataclass

import jax
import jax.numpy as jnp
from jax import lax
from jax.experimental import pallas as pl
from jax.experimental.pallas import tpu as pltpu


# ----------------------------- args (deterministic, in-script) --------------
@dataclass
class Args:
    metric: str = "maa"          # 'maa' -> margin ("standard") loss, 'acc' -> CE
    m: float = 0.3
    T: float = 0.1
    lagrangian_loss: bool = True
    lambda_P: float = 0.1
    rho: float = 0.01


# ----------------------------- Pallas kernel --------------------------------
def _make_loss_kernel(metric: str, m: float, t_thr: float,
                      S: int, T_rows: int, B: int):
    """Grid = (ceil(S / T_rows),).  Each step streams a (T_rows, B, C) slab of
    predictions, computes the per-row loss vectorized over T_rows, and adds it
    into a (B, 1) f32 scratch accumulator.  The scalar reduce + normalization
    + store happen only on the last grid step."""

    needs_mask = (S % T_rows) != 0   # padded rows must not contribute

    def kernel(onehot_ref, y_ref, out_ref, acc_ref):
        i = pl.program_id(0)

        @pl.when(i == 0)
        def _init():
            acc_ref[...] = jnp.zeros_like(acc_ref)
            out_ref[...] = jnp.zeros_like(out_ref)

        pred = y_ref[...].astype(jnp.float32)          # (T_rows, B, C)
        oh = onehot_ref[...][None, :, :]               # (1, B, C) f32, hoisted

        # fy = prediction.gather(1, label)  -> (T_rows, B, 1)
        fy = jnp.sum(pred * oh, axis=-1, keepdims=True)

        if metric == "maa":
            # fny = prediction.scatter_(1, label, -1e10); fnym = max(fny, 1)
            fny = jnp.where(oh > 0.5, jnp.float32(-1e10), pred)
            fnym = jnp.max(fny, axis=-1, keepdims=True)              # (T,B,1)
            l = (jnp.maximum(m + t_thr - fy, 0.0)
                 + jnp.maximum(m + fnym, 0.0))                       # (T,B,1)
        else:  # 'acc' -> torch.nn.CrossEntropyLoss() (mean reduction)
            mx = jnp.max(pred, axis=-1, keepdims=True)
            lse = mx + jnp.log(jnp.sum(jnp.exp(pred - mx),
                                       axis=-1, keepdims=True))
            l = lse - fy                                             # (T,B,1)

        if needs_mask:
            row = i * T_rows + lax.broadcasted_iota(jnp.int32,
                                                    (T_rows, 1, 1), 0)
            l = jnp.where(row < S, l, 0.0)

        # fold over the T_rows axis (elementwise vreg adds, no XLU) and
        # accumulate raw sums; all normalization deferred to finalize.
        acc_ref[...] = acc_ref[...] + jnp.sum(l, axis=0)             # (B, 1)

        @pl.when(i == pl.num_programs(0) - 1)
        def _finalize():
            out_ref[...] = (jnp.sum(acc_ref[...])
                            / jnp.float32(B * S)).reshape(1, 1)

    return kernel


# ----------------------------- wrapper ---------------------------------------
def pnn_loss(y, label, power_ratio, power_consumption,
             area_consumption=0.0, P_avg=0.0, A_avg=0.0, *, args: Args):
    F, N, B, C = y.shape
    S = F * N
    ys = y.reshape(S, B, C)                      # native dtype, no pre-cast

    # one-hot of the labels, computed once (tiny, B*C floats)
    onehot = (label.reshape(B, 1).astype(jnp.int32)
              == jnp.arange(C, dtype=jnp.int32).reshape(1, C)
              ).astype(jnp.float32)              # (B, C)

    # pick T_rows so each streamed block is ~1 MiB (safe on v7x's 64 MiB VMEM
    # as well: 2x double-buffered input ~2 MiB + 4 KiB scratch).
    bytes_per_slab = B * C * ys.dtype.itemsize
    target_bytes = 1 << 20
    T_rows = max(1, min(S, target_bytes // max(1, bytes_per_slab)))
    num_blocks = pl.cdiv(S, T_rows)
    S_pad = num_blocks * T_rows
    if S_pad != S:
        pad = jnp.zeros((S_pad - S, B, C), dtype=ys.dtype)
        ys = jnp.concatenate([ys, pad], axis=0)

    kernel = _make_loss_kernel(args.metric, args.m, args.T, S, T_rows, B)

    out = pl.pallas_call(
        kernel,
        out_shape=jax.ShapeDtypeStruct((1, 1), jnp.float32),
        grid_spec=pltpu.PrefetchScalarGridSpec(
            num_scalar_prefetch=0,
            grid=(num_blocks,),
            in_specs=[
                pl.BlockSpec((B, C), lambda i: (0, 0)),             # onehot
                pl.BlockSpec((T_rows, B, C), lambda i: (i, 0, 0)),  # y slab
            ],
            out_specs=pl.BlockSpec((1, 1), lambda i: (0, 0)),
            scratch_shapes=[pltpu.VMEM((B, 1), jnp.float32)],
        ),
        compiler_params=pltpu.CompilerParams(
            dimension_semantics=("arbitrary",)),
    )(onehot, ys)

    loss = out[0, 0]
    if args.lagrangian_loss:
        d = power_consumption - P_avg
        loss = loss + args.lambda_P * d + args.rho / 2.0 * d ** 2
    # (power_ratio, area_consumption, A_avg accepted but unused, as in torch)
    # TODO(synk): torch.gather raises on out-of-range labels; the one-hot mask
    # here silently yields fy=0 instead.
    return loss


# ----------------------------- pure-JAX reference ----------------------------
def pnn_loss_ref(y, label, power_consumption, P_avg, args: Args):
    F, N, B, C = y.shape
    onehot = jax.nn.one_hot(label, C, dtype=jnp.float32)  # [B, C]
    total = jnp.float32(0.0)
    for f in range(F):
        for n in range(N):
            pred = y[f, n].astype(jnp.float32)
            fy = jnp.sum(pred * onehot, axis=1, keepdims=True)
            if args.metric == "maa":
                fny = jnp.where(onehot > 0, -1e10, pred)
                fnym = jnp.max(fny, axis=1, keepdims=True)
                l = (jnp.maximum(args.m + args.T - fy, 0.0)
                     + jnp.maximum(args.m + fnym, 0.0))
                total += jnp.mean(l)
            else:
                lse = jax.nn.logsumexp(pred, axis=1, keepdims=True)
                total += jnp.mean(lse - fy)
    loss = total / N / F
    if args.lagrangian_loss:
        d = power_consumption - P_avg
        loss = loss + args.lambda_P * d + args.rho / 2.0 * d ** 2
    return loss


# ----------------------------- main -------------------------------------------
if __name__ == "__main__":
    key = jax.random.PRNGKey(0)
    F, N, B, C = 2, 3, 8, 16

    k1, k2 = jax.random.split(key)
    y = jax.random.normal(k1, (F, N, B, C), dtype=jnp.float32)
    label = jax.random.randint(k2, (B,), 0, C, dtype=jnp.int32)
    power_ratio = jnp.float32(0.5)          # unused by forward (matches torch)
    power_consumption = jnp.float32(1.5)
    P_avg = jnp.float32(1.0)

    args = Args(metric="maa")
    loss = pnn_loss(y, label, power_ratio, power_consumption,
                    P_avg=P_avg, args=args)
    loss = jax.block_until_ready(loss)

    ref = pnn_loss_ref(y, label, power_consumption, P_avg, args)
    assert jnp.allclose(loss, ref, rtol=1e-5, atol=1e-5), (loss, ref)

    # also exercise the cross-entropy ('acc') branch
    args_ce = Args(metric="acc", lagrangian_loss=False)
    loss_ce = jax.block_until_ready(
        pnn_loss(y, label, power_ratio, power_consumption, args=args_ce))
    ref_ce = pnn_loss_ref(y, label, power_consumption, P_avg, args_ce)
    assert jnp.allclose(loss_ce, ref_ce, rtol=1e-5, atol=1e-5), (loss_ce, ref_ce)

    print("KERNEL_OK")
</pallas_src>

<mosaic_0001>
module attributes {stable_mosaic.version = 11 : i64} {
  func.func @kernel(%arg0: i32, %arg1: memref<8x16xf32, #tpu.memory_space<vmem>>, %arg2: memref<6x8x16xf32, #tpu.memory_space<vmem>>, %arg3: memref<1x1xf32, #tpu.memory_space<vmem>>, %arg4: memref<8x1xf32, #tpu.memory_space<vmem>>) attributes {dimension_semantics = [#tpu.dimension_semantics<arbitrary>], iteration_bounds = array<i64: 1>, scalar_prefetch = 0 : i64, scratch_operands = 1 : i64, tpu.core_type = #tpu.core_type<tc>, window_params = [{pipeline_mode = #tpu.pipeline_mode<synchronous>, transform_indices = @transform_0, window_bounds = array<i64: 8, 16>}, {transform_indices = @transform_1, window_bounds = array<i64: 6, 8, 16>}, {pipeline_mode = #tpu.pipeline_mode<synchronous>, transform_indices = @transform_2, window_bounds = array<i64: 1, 1>}]} {
    %c0_i32 = arith.constant 0 : i32
    %0 = arith.cmpi eq, %arg0, %c0_i32 : i32
    %1 = arith.extui %0 : i1 to i32
    %c0_i32_0 = arith.constant 0 : i32
    %2 = arith.cmpi ne, %1, %c0_i32_0 : i32
    scf.if %2 {
      %cst_19 = arith.constant 0.000000e+00 : f32
      %34 = vector.broadcast %cst_19 : f32 to vector<8x1xf32>
      %c0_20 = arith.constant 0 : index
      %c0_21 = arith.constant 0 : index
      %35 = vector.load %arg4[%c0_20, %c0_21] : memref<8x1xf32, #tpu.memory_space<vmem>>, vector<8x1xf32>
      tpu.vector_store %arg4[%c0_20, %c0_21], %34 {strides = array<i32>} : memref<8x1xf32, #tpu.memory_space<vmem>>, vector<8x1xf32>,
      %cst_22 = arith.constant 0.000000e+00 : f32
      %36 = vector.broadcast %cst_22 : f32 to vector<1x1xf32>
      %c0_23 = arith.constant 0 : index
      %c0_24 = arith.constant 0 : index
      %37 = vector.load %arg3[%c0_23, %c0_24] : memref<1x1xf32, #tpu.memory_space<vmem>>, vector<1x1xf32>
      tpu.vector_store %arg3[%c0_23, %c0_24], %36 {strides = array<i32>} : memref<1x1xf32, #tpu.memory_space<vmem>>, vector<1x1xf32>,
    } else {
    }
    %c0 = arith.constant 0 : index
    %c0_1 = arith.constant 0 : index
    %c0_2 = arith.constant 0 : index
    %3 = vector.load %arg2[%c0, %c0_1, %c0_2] : memref<6x8x16xf32, #tpu.memory_space<vmem>>, vector<6x8x16xf32>
    %c0_3 = arith.constant 0 : index
    %c0_4 = arith.constant 0 : index
    %4 = vector.load %arg1[%c0_3, %c0_4] : memref<8x16xf32, #tpu.memory_space<vmem>>, vector<8x16xf32>
    %5 = vector.shape_cast %4 : vector<8x16xf32> to vector<1x8x16xf32>
    %6 = vector.broadcast %5 : vector<1x8x16xf32> to vector<6x8x16xf32>
    %7 = arith.mulf %3, %6 : vector<6x8x16xf32>
    %cst = arith.constant dense<0.000000e+00> : vector<6x8xf32>
    %8 = vector.multi_reduction <add>, %7, %cst [2] : vector<6x8x16xf32> to vector<6x8xf32>
    %9 = vector.shape_cast %8 : vector<6x8xf32> to vector<6x8x1xf32>
    %cst_5 = arith.constant 5.000000e-01 : f32
    %10 = vector.broadcast %cst_5 : f32 to vector<1x8x16xf32>
    %11 = arith.cmpf ogt, %5, %10 : vector<1x8x16xf32>
    %cst_6 = arith.constant -1.000000e+10 : f32
    %12 = vector.shape_cast %11 : vector<1x8x16xi1> to vector<1x8x16xi1>
    %13 = vector.broadcast %12 : vector<1x8x16xi1> to vector<6x8x16xi1>
    %14 = vector.broadcast %cst_6 : f32 to vector<6x8x16xf32>
    %15 = arith.select %13, %14, %3 : vector<6x8x16xi1>, vector<6x8x16xf32>
    %cst_7 = arith.constant dense<0xFF800000> : vector<6x8xf32>
    %16 = vector.multi_reduction <maximumf>, %15, %cst_7 [2] : vector<6x8x16xf32> to vector<6x8xf32>
    %17 = vector.shape_cast %16 : vector<6x8xf32> to vector<6x8x1xf32>
    %cst_8 = arith.constant 4.000000e-01 : f32
    %18 = vector.broadcast %cst_8 : f32 to vector<6x8x1xf32>
    %19 = arith.subf %18, %9 : vector<6x8x1xf32>
    %cst_9 = arith.constant 0.000000e+00 : f32
    %20 = vector.broadcast %cst_9 : f32 to vector<6x8x1xf32>
    %21 = arith.maximumf %19, %20 : vector<6x8x1xf32>
    %cst_10 = arith.constant 3.000000e-01 : f32
    %22 = vector.broadcast %cst_10 : f32 to vector<6x8x1xf32>
    %23 = arith.addf %22, %17 : vector<6x8x1xf32>
    %cst_11 = arith.constant 0.000000e+00 : f32
    %24 = vector.broadcast %cst_11 : f32 to vector<6x8x1xf32>
    %25 = arith.maximumf %23, %24 : vector<6x8x1xf32>
    %26 = arith.addf %21, %25 : vector<6x8x1xf32>
    %c0_12 = arith.constant 0 : index
    %c0_13 = arith.constant 0 : index
    %27 = vector.load %arg4[%c0_12, %c0_13] : memref<8x1xf32, #tpu.memory_space<vmem>>, vector<8x1xf32>
    %cst_14 = arith.constant dense<0.000000e+00> : vector<8x1xf32>
    %28 = vector.multi_reduction <add>, %26, %cst_14 [0] : vector<6x8x1xf32> to vector<8x1xf32>
    %29 = arith.addf %27, %28 : vector<8x1xf32>
    %c0_15 = arith.constant 0 : index
    %c0_16 = arith.constant 0 : index
    %30 = vector.load %arg4[%c0_15, %c0_16] : memref<8x1xf32, #tpu.memory_space<vmem>>, vector<8x1xf32>
    tpu.vector_store %arg4[%c0_15, %c0_16], %29 {strides = array<i32>} : memref<8x1xf32, #tpu.memory_space<vmem>>, vector<8x1xf32>,
    %c0_i32_17 = arith.constant 0 : i32
    %31 = arith.cmpi eq, %arg0, %c0_i32_17 : i32
    %32 = arith.extui %31 : i1 to i32
    %c0_i32_18 = arith.constant 0 : i32
    %33 = arith.cmpi ne, %32, %c0_i32_18 : i32
    scf.if %33 {
      %c0_19 = arith.constant 0 : index
      %c0_20 = arith.constant 0 : index
      %34 = vector.load %arg4[%c0_19, %c0_20] : memref<8x1xf32, #tpu.memory_space<vmem>>, vector<8x1xf32>
      %35 = vector.shape_cast %34 : vector<8x1xf32> to vector<1x8x1xf32>
      %cst_21 = arith.constant dense<0.000000e+00> : vector<1xf32>
      %36 = vector.multi_reduction <add>, %35, %cst_21 [1, 2] : vector<1x8x1xf32> to vector<1xf32>
      %37 = vector.shape_cast %36 : vector<1xf32> to vector<1x1x1xf32>
      %38 = vector.extract %37[0, 0, 0] : f32 from vector<1x1x1xf32>
      %cst_22 = arith.constant 4.800000e+01 : f32
      %39 = arith.divf %38, %cst_22 : f32
      %40 = vector.broadcast %39 : f32 to vector<1x1xf32>
      %c0_23 = arith.constant 0 : index
      %c0_24 = arith.constant 0 : index
      %41 = vector.load %arg3[%c0_23, %c0_24] : memref<1x1xf32, #tpu.memory_space<vmem>>, vector<1x1xf32>
      tpu.vector_store %arg3[%c0_23, %c0_24], %40 {strides = array<i32>} : memref<1x1xf32, #tpu.memory_space<vmem>>, vector<1x1xf32>,
    } else {
    }
    return
  }
  func.func @transform_0(%arg0: i32) -> (i32, i32) {
    %c0_i32 = arith.constant 0 : i32
    %c0_i32_0 = arith.constant 0 : i32
    %c0_i32_1 = arith.constant 0 : i32
    return %c0_i32, %c0_i32_0 : i32, i32
  }
  func.func @transform_1(%arg0: i32) -> (i32, i32, i32) {
    %c0_i32 = arith.constant 0 : i32
    %c0_i32_0 = arith.constant 0 : i32
    %c0_i32_1 = arith.constant 0 : i32
    return %arg0, %c0_i32, %c0_i32_0 : i32, i32, i32
  }
  func.func @transform_2(%arg0: i32) -> (i32, i32) {
    %c0_i32 = arith.constant 0 : i32
    %c0_i32_0 = arith.constant 0 : i32
    %c0_i32_1 = arith.constant 0 : i32
    return %c0_i32, %c0_i32_0 : i32, i32
  }
}

</mosaic_0001>

<bundles_post_ra>
// kernel: tpu_custom_call.1
= control target key start
LH: loop header
LB: loop body
LE: loop exit
PB: predicated region body
PF: predicated region fallthrough
CT: control target
= control target key end

     0   :  { %7 = vsyncpa [#allocation4], 0  ;;  %s347_s0 = inlined_call_operand.hbm [shape: f32[8,16], index: 0, kind: input, shape index: {}]   ;;  %s348_s1 = inlined_call_operand.hbm [shape: f32[6,8,16], index: 1, kind: input, shape index: {}]   ;;  %s349_s2 = inlined_call_operand.hbm [shape: f32[1,1], index: 2, kind: output, shape index: {}]  }
   0x1   :  { %8 = vsyncpa [#allocation7], 0 }
   0x2   :  { %9 = vsyncpa [#allocation5], 0  ;;  %s260_s9 = smov [#allocation3]   ;;  %s261_s11 = smov [#allocation6]  }
   0x3   :  { %s16_s10 = sshll.u32 %s260_s9, 4  ;;  %s25_s12 = sshll.u32 %s261_s11, 4  ;;  %s17_s10 = int_to_ptr.vmem [resolvable:$true] %s16_s10  ;;  %s281_s12 = int_to_ptr.vmem [resolvable:$true] %s25_s12 }
   0x4   :  { %s188_s15 = scalar_lea.hbm %s347_s0, 128 }
   0x5   :  { %p189_p0 = scmp.ne.s32.totalorder %s347_s0, %s188_s15  ;;  %p192_p1 = scmp.lt.u32.totalorder %s188_s15, %s347_s0 }
   0x7   :  { %p194_p2 = pnand %p192_p1, %p189_p0 }
   0x9   :  { %197 = shalt.err (!%p194_p2)
}
   0xa   :  { %s198_s20 = scalar_lea.vmem %s17_s10, 128  ;;  %p203_p4 = scmp.lt.s32.totalorder %s17_s10, %s17_s10 }
   0xb   :  { %p199_p3 = scmp.ne.s32.totalorder %s17_s10, %s198_s20  ;;  %p204_p5 = scmp.lt.s32.totalorder %s198_s20, %s198_s20 }
   0xd   :  { %p205_p6 = por %p204_p5, %p203_p4 }
   0xf   :  { %p206_p7 = pnand %p205_p6, %p199_p3 }
  0x11   :  { %209 = shalt.err (!%p206_p7)
}
  0x12   :  { %19 = dma.hbm_to_vmem [thread:$0]  %s347_s0, 128, %s17_s10, [#allocation4]  }
  0x13   :  { %s210_s25 = scalar_lea.hbm %s348_s1, 768 }
  0x14   :  { %p211_p8 = scmp.ne.s32.totalorder %s348_s1, %s210_s25  ;;  %p214_p9 = scmp.lt.u32.totalorder %s210_s25, %s348_s1 }
  0x16   :  { %p216_p10 = pnand %p214_p9, %p211_p8 }
  0x18   :  { %219 = shalt.err (!%p216_p10)
}
  0x19   :  { %s220_s30 = scalar_lea.vmem %s281_s12, 768  ;;  %p225_p12 = scmp.lt.s32.totalorder %s281_s12, %s281_s12 }
  0x1a   :  { %p221_p11 = scmp.ne.s32.totalorder %s281_s12, %s220_s30  ;;  %p226_p13 = scmp.lt.s32.totalorder %s220_s30, %s220_s30 }
  0x1c   :  { %p227_p0 = por %p226_p13, %p225_p12 }
  0x1e   :  { %p228_p1 = pnand %p227_p0, %p221_p11 }
  0x20   :  { %231 = shalt.err (!%p228_p1)
}
  0x21   :  { %s262_s0 = smov 128   ;;  %s263_s3 = smov 8  }
  0x22   :  { %31 = dma.hbm_to_vmem [thread:$0]  %s348_s1, 768, %s281_s12, [#allocation7], %s262_s0, %s262_s0, %s263_s3  }
  0x23   :  { %254 = dma.done.wait [#allocation4], 128  }
  0x24   :  { %255 = vsyncadd [#allocation4], 4294967168 }
  0x25   :  { %256 = dma.done.wait [#allocation7], 768  }
  0x26   :  { %257 = vsyncadd [#allocation7], 4294966528  ;;  %v46_v0 = vld [vmem:[#allocation6] sm:$0xff]  ;;  %v52_v1 = vld [vmem:[#allocation3] sm:$0xff]  ;;  %vm59_vm0 = vcmask 130048   ;;  %vm42_vm2 = vcmask 7168  }
  0x27   :  { %v47_v2 = vld [vmem:[#allocation6 + $0x8] sm:$0xff]  ;;  %vm78_vm1 = vcmp.gt.f32.partialorder %v52_v1, 0.5  ;;  %v53_v3 = vmul.f32 %v52_v1, %v46_v0  ;;  %v48_v7 = vld [vmem:[#allocation6 + $0x10] sm:$0xff]  ;;  %v49_v14 = vld [vmem:[#allocation6 + $0x18] sm:$0xff]  ;;  %v264_v31 = vmov 0.0   ;;  %vm44_vm3 = vcmask 0  }
  0x28   :  { %v54_v4 = vmul.f32 %v52_v1, %v47_v2  ;;  %v81_v5 = vsel %vm78_vm1, -1e+10, %v46_v0  ;;  %v82_v6 = vsel %vm78_vm1, -1e+10, %v47_v2  ;;  %v55_v12 = vmul.f32 %v52_v1, %v48_v7  ;;  %v50_v19 = vld [vmem:[#allocation6 + $0x20] sm:$0xff]  ;;  %v51_v24 = vld [vmem:[#allocation6 + $0x28] sm:$0xff] }
  0x29   :  { %v87_v8 = vsel %vm59_vm0, %v81_v5, -inf  ;;  %v60_v9 = vsel %vm59_vm0, %v53_v3, 0.0  ;;  %v90_v10 = vsel %vm59_vm0, %v82_v6, -inf  ;;  %v83_v13 = vsel %vm78_vm1, -1e+10, %v48_v7  ;;  %43 = vst.msk [vmem:[#allocation2] sm:$0xff] %vm42_vm2, %v264_v31 }
  0x2a   :  { %88 = vmax.xlane.f32.xlu1 %v87_v8  ;;  %61 = vadd.xlane.f32.xlu0 %v60_v9  ;;  %v63_v11 = vsel %vm59_vm0, %v54_v4, 0.0  ;;  %v93_v15 = vsel %vm59_vm0, %v83_v13, -inf  ;;  %v66_v16 = vsel %vm59_vm0, %v55_v12, 0.0  ;;  %v56_v17 = vmul.f32 %v52_v1, %v49_v14  ;;  %45 = vst.msk [vmem:[#allocation8] sm:$0x1] %vm44_vm3, %v264_v31  ;;  %s265_s1 = smov [#allocation8]  }
  0x2b   :  { %v84_v18 = vsel %vm78_vm1, -1e+10, %v49_v14  ;;  %v57_v22 = vmul.f32 %v52_v1, %v50_v19  ;;  %v85_v23 = vsel %vm78_vm1, -1e+10, %v50_v19  ;;  %v58_v27 = vmul.f32 %v52_v1, %v51_v24  ;;  %s170_s6 = sshll.u32 %s265_s1, 4  ;;  %s171_s6 = int_to_ptr.vmem [resolvable:$true] %s170_s6 }
  0x2c   :  { %v96_v20 = vsel %vm59_vm0, %v84_v18, -inf  ;;  %v69_v21 = vsel %vm59_vm0, %v56_v17, 0.0  ;;  %v99_v25 = vsel %vm59_vm0, %v85_v23, -inf  ;;  %v86_v28 = vsel %vm78_vm1, -1e+10, %v51_v24  ;;  %s232_s9 = scalar_lea.vmem %s171_s6, 16  ;;  %p237_p3 = scmp.lt.s32.totalorder %s171_s6, %s171_s6 }
  0x2d   :  { %v72_v26 = vsel %vm59_vm0, %v57_v22, 0.0  ;;  %v102_v29 = vsel %vm59_vm0, %v86_v28, -inf  ;;  %v75_v30 = vsel %vm59_vm0, %v58_v27, 0.0  ;;  %p233_p2 = scmp.ne.s32.totalorder %s171_s6, %s232_s9  ;;  %s236_s10 = scalar_lea.vmem %s171_s6, 32 }
  0x2e   :  { %91 = vmax.xlane.f32.xlu1 %v90_v10  ;;  %64 = vadd.xlane.f32.xlu0 %v63_v11  ;;  %p238_p4 = scmp.lt.s32.totalorder %s236_s10, %s232_s9 }
  0x30   :  { %v135_v14 = vld [vmem:[#allocation2] sm:$0xff]  ;;  %p239_p5 = por %p238_p4, %p237_p3 }
  0x32   :  { %94 = vmax.xlane.f32.xlu1 %v93_v15  ;;  %67 = vadd.xlane.f32.xlu0 %v66_v16  ;;  %p240_p6 = pnand %p239_p5, %p233_p2 }
  0x36   :  { %97 = vmax.xlane.f32.xlu1 %v96_v20  ;;  %70 = vadd.xlane.f32.xlu0 %v69_v21 }
  0x3a   :  { %100 = vmax.xlane.f32.xlu1 %v99_v25  ;;  %73 = vadd.xlane.f32.xlu0 %v72_v26 }
  0x3e   :  { %103 = vmax.xlane.f32.xlu1 %v102_v29  ;;  %76 = vadd.xlane.f32.xlu0 %v75_v30 }
  0xb7   :  { %v89_v32 = vpop.xlane.xlu1 %88  ;;  %v62_v33 = vpop.xlane.xlu0 %61 }
  0xb8   :  { %v117_v38 = vadd.f32 0.3, %v89_v32  ;;  %v105_v39 = vsub.f32 0.4, %v62_v33 }
  0xba   :  { %v123_v46 = vmax.f32 %v117_v38, 0.0  ;;  %v111_v47 = vmax.f32 %v105_v39, 0.0 }
  0xbb   :  { %v92_v34 = vpop.xlane.xlu1 %91  ;;  %v65_v35 = vpop.xlane.xlu0 %64 }
  0xbc   :  { %v118_v36 = vadd.f32 0.3, %v92_v34  ;;  %v106_v37 = vsub.f32 0.4, %v65_v35  ;;  %v129_v59 = vadd.f32 %v123_v46, %v111_v47 }
  0xbe   :  { %v124_v44 = vmax.f32 %v118_v36, 0.0  ;;  %v112_v45 = vmax.f32 %v106_v37, 0.0 }
  0xbf   :  { %v95_v40 = vpop.xlane.xlu1 %94  ;;  %v68_v41 = vpop.xlane.xlu0 %67 }
  0xc0   :  { %v119_v42 = vadd.f32 0.3, %v95_v40  ;;  %v107_v43 = vsub.f32 0.4, %v68_v41  ;;  %v130_v54 = vadd.f32 %v124_v44, %v112_v45 }
  0xc2   :  { %v125_v50 = vmax.f32 %v119_v42, 0.0  ;;  %v113_v51 = vmax.f32 %v107_v43, 0.0  ;;  %v136_v63 = vadd.f32 %v130_v54, %v129_v59 }
  0xc3   :  { %v98_v48 = vpop.xlane.xlu1 %97  ;;  %v71_v49 = vpop.xlane.xlu0 %70 }
  0xc4   :  { %v120_v52 = vadd.f32 0.3, %v98_v48  ;;  %v108_v53 = vsub.f32 0.4, %v71_v49  ;;  %v131_v60 = vadd.f32 %v125_v50, %v113_v51 }
  0xc6   :  { %v126_v55 = vmax.f32 %v120_v52, 0.0  ;;  %v114_v56 = vmax.f32 %v108_v53, 0.0  ;;  %v137_v5 = vadd.f32 %v136_v63, %v131_v60 }
  0xc7   :  { %v101_v57 = vpop.xlane.xlu1 %100  ;;  %v74_v58 = vpop.xlane.xlu0 %73 }
  0xc8   :  { %v121_v61 = vadd.f32 0.3, %v101_v57  ;;  %v109_v62 = vsub.f32 0.4, %v74_v58  ;;  %v132_v0 = vadd.f32 %v126_v55, %v114_v56 }
  0xca   :  { %v127_v1 = vmax.f32 %v121_v61, 0.0  ;;  %v115_v2 = vmax.f32 %v109_v62, 0.0  ;;  %v138_v9 = vadd.f32 %v137_v5, %v132_v0 }
  0xcb   :  { %v104_v3 = vpop.xlane.xlu1 %103  ;;  %v77_v4 = vpop.xlane.xlu0 %76 }
  0xcc   :  { %v133_v6 = vadd.f32 %v127_v1, %v115_v2  ;;  %v122_v7 = vadd.f32 0.3, %v104_v3  ;;  %v110_v8 = vsub.f32 0.4, %v77_v4 }
  0xce   :  { %v128_v10 = vmax.f32 %v122_v7, 0.0  ;;  %v116_v11 = vmax.f32 %v110_v8, 0.0  ;;  %v139_v12 = vadd.f32 %v138_v9, %v133_v6 }
  0xd0   :  { %v134_v13 = vadd.f32 %v128_v10, %v116_v11 }
  0xd2   :  { %v140_v15 = vadd.f32 %v139_v12, %v134_v13 }
  0xd4   :  { %v141_v16 = vadd.f32 %v140_v15, %v135_v14 }
  0xd6   :  { %143 = vst.msk [vmem:[#allocation2] sm:$0xff] %vm42_vm2, %v141_v16 }
  0xdd   :  { %v147_v17 = vld [vmem:[#allocation2] sm:$0xff] }
  0xde   :  { %v148_v18 = vsel %vm42_vm2, %v147_v17, 0.0 }
  0xdf   :  { %149 = vadd.xlane.f32.xlu0 %v148_v18 }
 0x16c   :  { %v150_v19 = vpop.xlane.xlu0 %149 }
 0x16d   :  { %v151_v20 = vrot.slane %v150_v19, 4 }
 0x16f   :  { %v152_v21 = vadd.f32 %v151_v20, %v150_v19 }
 0x171   :  { %v153_v22 = vrot.slane %v152_v21, 2 }
 0x173   :  { %v154_v23 = vadd.f32 %v153_v22, %v152_v21 }
 0x175   :  { %v155_v24 = vrot.slane %v154_v23, 1 }
 0x177   :  { %v156_v25 = vadd.f32 %v155_v24, %v154_v23 }
 0x179   :  { %180 = vpush %v156_v25 }
 0x1aa   :  { %s181_s7 = spop %180 }
 0x1ab   :  { %s160_s8 = smul.f32 0.020833334, %s181_s7 }
 0x1ad   :  { %v161_v26 = vstv %s160_s8 }
 0x1ae   :  { %163 = vst.msk [vmem:[#allocation8] sm:$0x1] %vm44_vm3, %v161_v26 }
 0x1af   :  { %243 = shalt.err (!%p240_p6)
}
 0x1b0   :  { %s244_s13 = scalar_lea.hbm %s349_s2, 16 }
 0x1b1   :  { %p245_p7 = scmp.ne.s32.totalorder %s349_s2, %s244_s13  ;;  %p248_p8 = scmp.lt.u32.totalorder %s244_s13, %s349_s2 }
 0x1b3   :  { %p250_p9 = pnand %p248_p8, %p245_p7 }
 0x1b5   :  { %253 = shalt.err (!%p250_p9)
}
 0x1b6   :  { %173 = dma.vmem_to_hbm [thread:$0]  %s171_s6, 16, %s349_s2, [#allocation5]  }
 0x1b7   :  { %258 = dma.done.wait [#allocation5], 16  }
 0x1b8   :  { %259 = vsyncadd [#allocation5], 4294967280 }
 0x1b9   :  { %177 = vsyncpa [#allocation4], 1 }
 0x1ba   :  { %178 = vsyncpa [#allocation7], 1 }
 0x1bb   :  { %179 = vsyncpa [#allocation5], 1 }

</bundles_post_ra>
